<compile_context>
chip_gen: v7x
topology: tpu7x:2x2x1
jax: 0.10.0
libtpu: 0.0.40
codegen_flags: <defaults>
</compile_context>

<pallas_src>
import jax
import jax.numpy as jnp
from jax.experimental import pallas as pl
from jax.experimental.pallas import tpu as pltpu  # noqa: F401  (TPU backend)

LANE = 128


def _round_up(x, m):
    return ((x + m - 1) // m) * m


def _fused_sage_kernel(a_ref, inv_ref, x_ref, w1_ref, b1_ref, w2_ref, b2_ref,
                       o_ref):
    """Fully fused 2-layer GraphSAGE forward.

    a_ref  : [N, N]       binary adjacency (dst-major, exact 0/1), bf16
    inv_ref: [N, 1]       1 / max(in_deg, 1), f32
    x_ref  : [N, FP]      node features (lane-padded), bf16
    w1_ref : [2*FP, HP]   vstack([W1_self; W1_neigh]) (padded), bf16
    b1_ref : [1, HP]      layer-1 bias (lane-padded), f32
    w2_ref : [2*HP, CP]   vstack([W2_self; W2_neigh]) (padded), bf16
    b2_ref : [1, CP]      layer-2 bias (lane-padded), f32
    o_ref  : [N, CP]      final output (lane-padded), f32
    """
    a = a_ref[...]                                   # [N, N]  bf16 (exact 0/1)
    inv_deg = inv_ref[...]                           # [N, 1]  f32
    x = x_ref[...]                                   # [N, FP] bf16
    dt = a.dtype

    # ---- Layer 1: h = relu(concat([x, mean_N(x)]) @ W1 + b1) ----------------
    # Exact binary A dot in f32 accumulation, then f32 per-row mean scale.
    x_n = jnp.dot(a, x, preferred_element_type=jnp.float32) * inv_deg
    xt = jnp.concatenate([x, x_n.astype(dt)], axis=1)          # [N, 2*FP]
    h = jnp.dot(xt, w1_ref[...], preferred_element_type=jnp.float32) + b1_ref[...]
    h = jnp.maximum(h, 0.0).astype(dt)                          # [N, HP] bf16

    # ---- Layer 2: out = concat([h, mean_N(h)]) @ W2 + b2 --------------------
    h_n = jnp.dot(a, h, preferred_element_type=jnp.float32) * inv_deg
    ht = jnp.concatenate([h, h_n.astype(dt)], axis=1)          # [N, 2*HP]
    out = jnp.dot(ht, w2_ref[...], preferred_element_type=jnp.float32) + b2_ref[...]
    o_ref[...] = out.astype(o_ref.dtype)


@jax.jit
def model_forward(adj, x, params):
    """Two-layer GraphSAGE: relu(SAGEConv1) -> SAGEConv2, one pallas_call.

    adj: [N, N] binary (0/1) adjacency, adj[i, j] = 1 iff edge j -> i.
    """
    n = adj.shape[0]
    in_feats = x.shape[1]
    h_feats = params["b1"].shape[0]
    num_classes = params["b2"].shape[0]
    fp = _round_up(in_feats, LANE)       # lane-padded input width
    hp = _round_up(h_feats, LANE)        # lane-padded hidden width
    cp = _round_up(num_classes, LANE)    # lane-padded output width

    dt = jnp.bfloat16
    a_bin = adj.astype(dt)                                       # exact 0/1
    in_deg = adj.sum(axis=1, keepdims=True)
    inv_deg = (1.0 / jnp.maximum(in_deg, 1.0)).astype(jnp.float32)  # [N, 1]
    x_pad = jnp.pad(x, ((0, 0), (0, fp - in_feats))).astype(dt)    # [N, FP]

    # Stacked [self; neigh] weights, zero-padded to lane-dense widths.
    w1s = jnp.pad(params["w1_self"], ((0, fp - in_feats), (0, hp - h_feats)))
    w1n = jnp.pad(params["w1_neigh"], ((0, fp - in_feats), (0, hp - h_feats)))
    w1 = jnp.concatenate([w1s, w1n], axis=0).astype(dt)          # [2*FP, HP]
    b1 = jnp.pad(params["b1"], (0, hp - h_feats)).reshape(1, hp).astype(jnp.float32)
    w2s = jnp.pad(params["w2_self"], ((0, hp - h_feats), (0, cp - num_classes)))
    w2n = jnp.pad(params["w2_neigh"], ((0, hp - h_feats), (0, cp - num_classes)))
    w2 = jnp.concatenate([w2s, w2n], axis=0).astype(dt)          # [2*HP, CP]
    b2 = jnp.pad(params["b2"], (0, cp - num_classes)).reshape(1, cp).astype(jnp.float32)

    out_padded = pl.pallas_call(
        _fused_sage_kernel,
        out_shape=jax.ShapeDtypeStruct((n, cp), jnp.float32),
        in_specs=[
            pl.BlockSpec((n, n), lambda: (0, 0)),
            pl.BlockSpec((n, 1), lambda: (0, 0)),
            pl.BlockSpec((n, fp), lambda: (0, 0)),
            pl.BlockSpec((2 * fp, hp), lambda: (0, 0)),
            pl.BlockSpec((1, hp), lambda: (0, 0)),
            pl.BlockSpec((2 * hp, cp), lambda: (0, 0)),
            pl.BlockSpec((1, cp), lambda: (0, 0)),
        ],
        out_specs=pl.BlockSpec((n, cp), lambda: (0, 0)),
    )(a_bin, inv_deg, x_pad, w1, b1, w2, b2)
    # TODO(synk): at scale, emit bf16 / only the real class lanes to cut writeback.
    return out_padded[:, :num_classes]


def model_forward_ref(adj, x, params):
    """Pure-JAX f32 reference of the same forward (for correctness check)."""
    in_deg = adj.sum(axis=1, keepdims=True)
    a_norm = adj / jnp.maximum(in_deg, 1.0)
    h_n = a_norm @ x
    h = x @ params["w1_self"] + h_n @ params["w1_neigh"] + params["b1"]
    h = jnp.maximum(h, 0.0)
    h_n2 = a_norm @ h
    return h @ params["w2_self"] + h_n2 @ params["w2_neigh"] + params["b2"]


def init_params(key, in_feats, h_feats, num_classes):
    """Deterministic init mirroring nn.Linear(in*2, out) weight/bias shapes."""
    k1, k2, k3, k4 = jax.random.split(key, 4)
    s1 = 1.0 / jnp.sqrt(2.0 * in_feats)
    w1 = jax.random.uniform(k1, (h_feats, 2 * in_feats), jnp.float32, -s1, s1)
    b1 = jax.random.uniform(k2, (h_feats,), jnp.float32, -s1, s1)
    s2 = 1.0 / jnp.sqrt(2.0 * h_feats)
    w2 = jax.random.uniform(k3, (num_classes, 2 * h_feats), jnp.float32, -s2, s2)
    b2 = jax.random.uniform(k4, (num_classes,), jnp.float32, -s2, s2)
    # Split concat-weight into self / neighbor halves, transpose to [Fin, Fout]
    # (concat([h, h_N]) @ W.T + b == h @ W_self + h_N @ W_neigh + b).
    return {
        "w1_self": w1[:, :in_feats].T,
        "w1_neigh": w1[:, in_feats:].T,
        "b1": b1,
        "w2_self": w2[:, :h_feats].T,
        "w2_neigh": w2[:, h_feats:].T,
        "b2": b2,
    }


def build_graph(key, n_nodes, edge_prob=0.1):
    """Random directed graph as a dense BINARY adjacency [N_dst, N_src]."""
    adj = (jax.random.uniform(key, (n_nodes, n_nodes)) < edge_prob).astype(jnp.float32)
    adj = adj * (1.0 - jnp.eye(n_nodes, dtype=jnp.float32))  # no self loops
    return adj


if __name__ == "__main__":
    N_NODES = 64
    IN_FEATS = 16
    H_FEATS = 32
    NUM_CLASSES = 8

    key = jax.random.PRNGKey(0)
    kg, kx, kp = jax.random.split(key, 3)

    adj = build_graph(kg, N_NODES)
    x = jax.random.normal(kx, (N_NODES, IN_FEATS), dtype=jnp.float32)
    params = init_params(kp, IN_FEATS, H_FEATS, NUM_CLASSES)

    out = model_forward(adj, x, params)
    out = jax.block_until_ready(out)

    ref = model_forward_ref(adj, x, params)

    assert out.shape == (N_NODES, NUM_CLASSES)
    assert jnp.all(jnp.isfinite(out))
    # Binary-exact A + f32 row scale: only bf16 feature/weight quantization left.
    max_err = float(jnp.max(jnp.abs(out - ref)))
    assert jnp.allclose(out, ref, atol=3e-2, rtol=3e-2), max_err
    print("KERNEL_OK")
</pallas_src>

<mosaic_0001>
module attributes {stable_mosaic.version = 11 : i64} {
  func.func @_fused_sage_kernel(%arg0: memref<64x64xbf16, #tpu.memory_space<vmem>>, %arg1: memref<64x1xf32, #tpu.memory_space<vmem>>, %arg2: memref<64x128xbf16, #tpu.memory_space<vmem>>, %arg3: memref<256x128xbf16, #tpu.memory_space<vmem>>, %arg4: memref<1x128xf32, #tpu.memory_space<vmem>>, %arg5: memref<256x128xbf16, #tpu.memory_space<vmem>>, %arg6: memref<1x128xf32, #tpu.memory_space<vmem>>, %arg7: memref<64x128xf32, #tpu.memory_space<vmem>>) attributes {dimension_semantics = [], scalar_prefetch = 0 : i64, scratch_operands = 0 : i64, tpu.core_type = #tpu.core_type<tc>} {
    %c0 = arith.constant 0 : index
    %c0_0 = arith.constant 0 : index
    %0 = vector.load %arg0[%c0, %c0_0] : memref<64x64xbf16, #tpu.memory_space<vmem>>, vector<64x64xbf16>
    %c0_1 = arith.constant 0 : index
    %c0_2 = arith.constant 0 : index
    %1 = vector.load %arg1[%c0_1, %c0_2] : memref<64x1xf32, #tpu.memory_space<vmem>>, vector<64x1xf32>
    %c0_3 = arith.constant 0 : index
    %c0_4 = arith.constant 0 : index
    %2 = vector.load %arg2[%c0_3, %c0_4] : memref<64x128xbf16, #tpu.memory_space<vmem>>, vector<64x128xbf16>
    %cst = arith.constant dense<0.000000e+00> : vector<64x128xf32>
    %3 = tpu.matmul %0, %2, %cst {dimension_numbers = #tpu.dot_dimension_numbers<[1], [0], [0], [1], [0, 0, 1, 1], [], []>} : vector<64x64xbf16>, vector<64x128xbf16>, vector<64x128xf32> -> vector<64x128xf32>
    %4 = vector.broadcast %1 : vector<64x1xf32> to vector<64x128xf32>
    %5 = arith.mulf %3, %4 : vector<64x128xf32>
    %6 = arith.truncf %5 : vector<64x128xf32> to vector<64x128xbf16>
    %7 = tpu.concatenate %2, %6 in 1 : vector<64x128xbf16>, vector<64x128xbf16> -> vector<64x256xbf16>
    %c0_5 = arith.constant 0 : index
    %c0_6 = arith.constant 0 : index
    %8 = vector.load %arg3[%c0_5, %c0_6] : memref<256x128xbf16, #tpu.memory_space<vmem>>, vector<256x128xbf16>
    %cst_7 = arith.constant dense<0.000000e+00> : vector<64x128xf32>
    %9 = tpu.matmul %7, %8, %cst_7 {dimension_numbers = #tpu.dot_dimension_numbers<[1], [0], [0], [1], [0, 0, 1, 1], [], []>} : vector<64x256xbf16>, vector<256x128xbf16>, vector<64x128xf32> -> vector<64x128xf32>
    %c0_8 = arith.constant 0 : index
    %c0_9 = arith.constant 0 : index
    %10 = vector.load %arg4[%c0_8, %c0_9] : memref<1x128xf32, #tpu.memory_space<vmem>>, vector<1x128xf32>
    %11 = vector.broadcast %10 : vector<1x128xf32> to vector<64x128xf32>
    %12 = arith.addf %9, %11 : vector<64x128xf32>
    %cst_10 = arith.constant 0.000000e+00 : f32
    %13 = vector.broadcast %cst_10 : f32 to vector<64x128xf32>
    %14 = arith.maximumf %12, %13 : vector<64x128xf32>
    %15 = arith.truncf %14 : vector<64x128xf32> to vector<64x128xbf16>
    %cst_11 = arith.constant dense<0.000000e+00> : vector<64x128xf32>
    %16 = tpu.matmul %0, %15, %cst_11 {dimension_numbers = #tpu.dot_dimension_numbers<[1], [0], [0], [1], [0, 0, 1, 1], [], []>} : vector<64x64xbf16>, vector<64x128xbf16>, vector<64x128xf32> -> vector<64x128xf32>
    %17 = vector.broadcast %1 : vector<64x1xf32> to vector<64x128xf32>
    %18 = arith.mulf %16, %17 : vector<64x128xf32>
    %19 = arith.truncf %18 : vector<64x128xf32> to vector<64x128xbf16>
    %20 = tpu.concatenate %15, %19 in 1 : vector<64x128xbf16>, vector<64x128xbf16> -> vector<64x256xbf16>
    %c0_12 = arith.constant 0 : index
    %c0_13 = arith.constant 0 : index
    %21 = vector.load %arg5[%c0_12, %c0_13] : memref<256x128xbf16, #tpu.memory_space<vmem>>, vector<256x128xbf16>
    %cst_14 = arith.constant dense<0.000000e+00> : vector<64x128xf32>
    %22 = tpu.matmul %20, %21, %cst_14 {dimension_numbers = #tpu.dot_dimension_numbers<[1], [0], [0], [1], [0, 0, 1, 1], [], []>} : vector<64x256xbf16>, vector<256x128xbf16>, vector<64x128xf32> -> vector<64x128xf32>
    %c0_15 = arith.constant 0 : index
    %c0_16 = arith.constant 0 : index
    %23 = vector.load %arg6[%c0_15, %c0_16] : memref<1x128xf32, #tpu.memory_space<vmem>>, vector<1x128xf32>
    %24 = vector.broadcast %23 : vector<1x128xf32> to vector<64x128xf32>
    %25 = arith.addf %22, %24 : vector<64x128xf32>
    %c0_17 = arith.constant 0 : index
    %c0_18 = arith.constant 0 : index
    %26 = vector.load %arg7[%c0_17, %c0_18] : memref<64x128xf32, #tpu.memory_space<vmem>>, vector<64x128xf32>
    tpu.vector_store %arg7[%c0_17, %c0_18], %25 {strides = array<i32>} : memref<64x128xf32, #tpu.memory_space<vmem>>, vector<64x128xf32>,
    return
  }
}

</mosaic_0001>

<bundles_post_ra>
// kernel: model_forward.1
= control target key start
LH: loop header
LB: loop body
LE: loop exit
PB: predicated region body
PF: predicated region fallthrough
CT: control target
= control target key end

     0   :  { %v947_v1 = vmov 0   ;;  %vm95_vm0 = vcmask 523264   ;;  %s1254_s2 = inlined_call_operand.vmem [shape: bf16[64,128], index: 2, kind: input, shape index: {}]   ;;  %s1255_s0 = inlined_call_operand.vmem [shape: bf16[64,64], index: 0, kind: input, shape index: {}]   ;;  %s1256_s1 = inlined_call_operand.vmem [shape: f32[64,1], index: 1, kind: input, shape index: {}]   ;;  %s1257_s3 = inlined_call_operand.vmem [shape: bf16[256,128], index: 3, kind: input, shape index: {}]   ;;  %s1258_s5 = inlined_call_operand.vmem [shape: bf16[256,128], index: 5, kind: input, shape index: {}]   ;;  %s1259_s4 = inlined_call_operand.vmem [shape: f32[1,128], index: 4, kind: input, shape index: {}]   ;;  %s1260_s6 = inlined_call_operand.vmem [shape: f32[1,128], index: 6, kind: input, shape index: {}]   ;;  %s1261_s7 = inlined_call_operand.vmem [shape: f32[64,128], index: 7, kind: output, shape index: {}]  }
   0x1   :  { %v991_v0 = vld [vmem:[%s1254_s2] sm:$0xff]   ;;  %905 = vset.pattern.permute.xlu0 %v947_v1  ;;  %906 = vset.pattern.permute.xlu1 %v947_v1  ;;  %v996_v2 = vld [vmem:[%s1254_s2 + $0x8] sm:$0xff]   ;;  %v1003_v3 = vld [vmem:[%s1254_s2 + $0x10] sm:$0xff]  }
   0x2   :  { %872 = vmatprep.subr.bf16.mxu1 %v991_v0  ;;  %v911_v4 = vld [vmem:[%s1255_s0] sm:$0xff]   ;;  %v1016_v5 = vld [vmem:[%s1254_s2 + $0x18] sm:$0xff]   ;;  %v37_v7 = vld [vmem:[%s1256_s1 + $0x10] sm:$0xff] }
   0x3   :  { %873 = vmatpush3.bf16.msra.mxu1 %v991_v0  ;;  %880 = vmatprep.mubr.msk.bf16.mxu1 %vm95_vm0, %v911_v4  ;;  %v35_v6 = vld [vmem:[%s1256_s1] sm:$0xff]  ;;  %v36_v8 = vld [vmem:[%s1256_s1 + $0x8] sm:$0xff]  ;;  %v38_v9 = vld [vmem:[%s1256_s1 + $0x18] sm:$0xff] }
   0x4   :  { %874 = vmatprep.subr.bf16.mxu1 %v996_v2  ;;  %896 = vmatprep.mubr.msk.bf16.mxu0 %vm95_vm0, %v911_v4  ;;  %v1035_v10 = vld [vmem:[%s1255_s0 + $0x8] sm:$0xff]   ;;  %v915_v11 = vld [vmem:[%s1257_s3 + $0x40] sm:$0xff]   ;;  %v1043_v12 = vld [vmem:[%s1255_s0 + $0x10] sm:$0xff]  }
   0x5   :  { %175 = vperm.xlu0 %905, %v35_v6   ;;  %185 = vperm.xlu1 %906, %v37_v7   ;;  %v39_v13 = vld [vmem:[%s1256_s1 + $0x20] sm:$0xff]  ;;  %v40_v14 = vld [vmem:[%s1256_s1 + $0x28] sm:$0xff]  ;;  %v41_v17 = vld [vmem:[%s1256_s1 + $0x30] sm:$0xff] }
   0x6   :  { %v916_v15 = vld [vmem:[%s1257_s3] sm:$0xff]   ;;  %v917_v16 = vld [vmem:[%s1257_s3 + $0x48] sm:$0xff]   ;;  %v42_v18 = vld [vmem:[%s1256_s1 + $0x38] sm:$0xff] }
   0x7   :  { %875 = vmatpush3.bf16.msra.mxu1 %v996_v2  ;;  %v918_v19 = vld [vmem:[%s1257_s3 + $0x8] sm:$0xff]   ;;  %v1074_v20 = vld [vmem:[%s1255_s0 + $0x18] sm:$0xff]   ;;  %v919_v21 = vld [vmem:[%s1257_s3 + $0x50] sm:$0xff]  }
   0x8   :  { %876 = vmatprep.subr.bf16.mxu1 %v1003_v3  ;;  %v920_v22 = vld [vmem:[%s1257_s3 + $0x10] sm:$0xff]   ;;  %v921_v23 = vld [vmem:[%s1257_s3 + $0x58] sm:$0xff]   ;;  %v923_v25 = vld [vmem:[%s1257_s3 + $0x60] sm:$0xff]  }
   0x9   :  { %180 = vperm.xlu0 %905, %v36_v8   ;;  %190 = vperm.xlu1 %906, %v38_v9   ;;  %v922_v24 = vld [vmem:[%s1257_s3 + $0x18] sm:$0xff]   ;;  %v924_v26 = vld [vmem:[%s1257_s3 + $0x20] sm:$0xff]   ;;  %v925_v27 = vld [vmem:[%s1257_s3 + $0x68] sm:$0xff]  }
   0xa   :  { %v926_v28 = vld [vmem:[%s1257_s3 + $0x28] sm:$0xff]   ;;  %v927_v29 = vld [vmem:[%s1257_s3 + $0x70] sm:$0xff]   ;;  %v929_v31 = vld [vmem:[%s1257_s3 + $0x78] sm:$0xff]  }
   0xb   :  { %877 = vmatpush3.bf16.msra.mxu1 %v1003_v3  ;;  %v928_v30 = vld [vmem:[%s1257_s3 + $0x30] sm:$0xff]   ;;  %v930_v32 = vld [vmem:[%s1257_s3 + $0x38] sm:$0xff]   ;;  %v738_v62 = vld [vmem:[%s1259_s4] ss:$0 sm:$0xff] }
   0xc   :  { %878 = vmatprep.subr.bf16.mxu1 %v1016_v5 }
   0xd   :  { %195 = vperm.xlu0 %905, %v39_v13   ;;  %200 = vperm.xlu1 %906, %v40_v14  }
   0xf   :  { %879 = vmatpush3.bf16.msra.mxu1 %v1016_v5 }
  0x10   :  { %784 = vmatprep.subr.bf16.mxu1 %v915_v11 }
  0x11   :  { %205 = vperm.xlu0 %905, %v41_v17   ;;  %210 = vperm.xlu1 %906, %v42_v18  }
  0x12   :  { %881 = vmatmul.mubr.msk.bf16.vlgmr.msra.gmra.mrb[0].mxu1 %vm95_vm0, %v1035_v10 }
  0x13   :  { %884 = vmatprep.mubr.msk.bf16.mxu1 %vm95_vm0, %v1043_v12  ;;  %785 = vmatpush3.bf16.msra.mxu1 %v916_v15 }
  0x14   :  { %786 = vmatprep.subr.bf16.mxu1 %v917_v16 }
  0x17   :  { %787 = vmatpush3.bf16.msra.mxu1 %v918_v19 }
  0x18   :  { %788 = vmatprep.subr.bf16.mxu1 %v919_v21 }
  0x1a   :  { %885 = vmatmul.mubr.msk.bf16.gmra.mrb[4].mxu1 %vm95_vm0, %v1074_v20 }
  0x1b   :  { %789 = vmatpush3.bf16.msra.mxu1 %v920_v22 }
  0x1c   :  { %790 = vmatprep.subr.bf16.mxu1 %v921_v23 }
  0x1f   :  { %791 = vmatpush3.bf16.msra.mxu1 %v922_v24 }
  0x20   :  { %792 = vmatprep.subr.bf16.mxu1 %v923_v25 }
  0x23   :  { %793 = vmatpush3.bf16.msra.mxu1 %v924_v26 }
  0x24   :  { %794 = vmatprep.subr.bf16.mxu1 %v925_v27 }
  0x27   :  { %795 = vmatpush3.bf16.msra.mxu1 %v926_v28 }
  0x28   :  { %796 = vmatprep.subr.bf16.mxu1 %v927_v29 }
  0x2b   :  { %797 = vmatpush3.bf16.msra.mxu1 %v928_v30 }
  0x2c   :  { %798 = vmatprep.subr.bf16.mxu1 %v929_v31 }
  0x2f   :  { %799 = vmatpush3.bf16.msra.mxu1 %v930_v32 }
  0x84   :  { %v1114_v33 = vpop.permute.xlu0 %175  ;;  %v1116_v34 = vpop.permute.xlu1 %185 }
  0x88   :  { %v1118_v35 = vpop.permute.xlu0 %180  ;;  %v1120_v36 = vpop.permute.xlu1 %190 }
  0x8c   :  { %v1122_v40 = vpop.permute.xlu0 %195  ;;  %v1127_v45 = vpop.permute.xlu1 %200 }
  0x90   :  { %v1130_v50 = vpop.permute.xlu0 %205  ;;  %v1133_v52 = vpop.permute.xlu1 %210 }
  0xe5   :  { %v882_v37 = vpop.f32.mrb[0].mxu1 }
  0xe6   :  { %v142_v38 = vpop.f32.mrb[1].mxu1  ;;  %v215_v41 = vmul.f32 %v882_v37, %v1116_v34 }
  0xe7   :  { %v883_v39 = vpop.f32.mrb[2].mxu1  ;;  %v213_v44 = vmul.f32 %v1114_v33, %v142_v38 }
  0xe8   :  { %v216_v42 = vmul.f32 %v883_v39, %v1120_v36  ;;  %v145_v43 = vpop.f32.mrb[3].mxu1 }
  0xe9   :  { %v214_v46 = vmul.f32 %v1118_v35, %v145_v43 }
  0xea   :  { %v222_v47 = vpack.c.bf16 %v216_v42, %v215_v41 }
  0xeb   :  { %v221_v48 = vpack.c.bf16 %v214_v46, %v213_v44 }
  0xed   :  { %v886_v49 = vpop.f32.mrb[4].mxu1  ;;  %392 = vmatprep.mubr.bf16.mxu1 %v221_v48 }
  0xee   :  { %v158_v51 = vpop.f32.mrb[5].mxu1  ;;  %393 = vmatmul.mubr.bf16.vlgmr.msra.gmra.mrb[8].mxu1 %v991_v0  ;;  %v219_v54 = vmul.f32 %v886_v49, %v1130_v50 }
  0xef   :  { %v887_v53 = vpop.f32.mrb[6].mxu1  ;;  %400 = vmatprep.mubr.bf16.mxu1 %v222_v47  ;;  %v217_v57 = vmul.f32 %v1122_v40, %v158_v51 }
  0xf0   :  { %v220_v55 = vmul.f32 %v887_v53, %v1133_v52  ;;  %v161_v56 = vpop.f32.mrb[7].mxu1  ;;  %v931_v53 = vld [vmem:[%s1258_s5 + $0x40] sm:$0xff]  }
  0xf1   :  { %v218_v58 = vmul.f32 %v1127_v45, %v161_v56  ;;  %v934_v56 = vld [vmem:[%s1258_s5 + $0x8] sm:$0xff]  }
  0xf2   :  { %v224_v59 = vpack.c.bf16 %v220_v55, %v219_v54  ;;  %v932_v54 = vld [vmem:[%s1258_s5] sm:$0xff]   ;;  %v933_v55 = vld [vmem:[%s1258_s5 + $0x48] sm:$0xff]  }
  0xf3   :  { %v223_v60 = vpack.c.bf16 %v218_v58, %v217_v57  ;;  %v935_v57 = vld [vmem:[%s1258_s5 + $0x50] sm:$0xff]  }
  0xf4   :  { %v936_v58 = vld [vmem:[%s1258_s5 + $0x10] sm:$0xff]  }
  0xf6   :  { %401 = vmatmul.mubr.bf16.gmra.mrb[12].mxu1 %v996_v2 }
  0xf7   :  { %408 = vmatprep.mubr.bf16.mxu1 %v223_v60  ;;  %v940_v60 = vld [vmem:[%s1258_s5 + $0x20] sm:$0xff]  }
  0xfe   :  { %409 = vmatmul.mubr.bf16.gmra.mrb[16].mxu1 %v1003_v3 }
  0xff   :  { %416 = vmatprep.mubr.bf16.mxu1 %v224_v59  ;;  %v939_v59 = vld [vmem:[%s1258_s5 + $0x60] sm:$0xff]  }
 0x106   :  { %417 = vmatmul.mubr.bf16.gmra.mrb[20].mxu1 %v1016_v5 }
 0x1c1   :  { %v800_v61 = vpop.f32.mrb[8].mxu1 }
 0x1c2   :  { %v801_v63 = vpop.f32.mrb[9].mxu1 }
 0x1c3   :  { %v802_v0 = vadd.f32 %v801_v63, %v800_v61  ;;  %v803_v1 = vpop.f32.mrb[10].mxu1  ;;  %v942_v61 = vld [vmem:[%s1258_s5 + $0x28] sm:$0xff]   ;;  %v944_v63 = vld [vmem:[%s1258_s5 + $0x30] sm:$0xff]  }
 0x1c4   :  { %v804_v4 = vpop.f32.mrb[11].mxu1 }
 0x1c5   :  { %v395_v6 = vadd.f32 %v802_v0, %v738_v62  ;;  %v805_v7 = vadd.f32 %v804_v4, %v803_v1  ;;  %v945_v0 = vld [vmem:[%s1258_s5 + $0x78] sm:$0xff]  }
 0x1c6   :  { %v946_v1 = vld [vmem:[%s1258_s5 + $0x38] sm:$0xff]  }
 0x1c7   :  { %v398_v8 = vadd.f32 %v805_v7, %v738_v62  ;;  %v425_v9 = vmax.f32 %v395_v6, 0.0 }
 0x1c9   :  { %v426_v2 = vmax.f32 %v398_v8, 0.0  ;;  %v806_v11 = vpop.f32.mrb[12].mxu1 }
 0x1ca   :  { %v807_v13 = vpop.f32.mrb[13].mxu1 }
 0x1cb   :  { %v808_v3 = vadd.f32 %v807_v13, %v806_v11  ;;  %v809_v14 = vpop.f32.mrb[14].mxu1  ;;  %v1145_v15 = vpack.c.bf16 %v426_v2, %v425_v9 }
 0x1cc   :  { %v810_v5 = vpop.f32.mrb[15].mxu1 }
 0x1cd   :  { %v403_v16 = vadd.f32 %v808_v3, %v738_v62  ;;  %v811_v17 = vadd.f32 %v810_v5, %v809_v14  ;;  %888 = vmatprep.subr.bf16.mxu0 %v1145_v15 }
 0x1ce   :  { %889 = vmatpush3.bf16.msra.mxu0 %v1145_v15 }
 0x1cf   :  { %v406_v18 = vadd.f32 %v811_v17, %v738_v62  ;;  %v427_v19 = vmax.f32 %v403_v16, 0.0 }
 0x1d1   :  { %v428_v21 = vmax.f32 %v406_v18, 0.0  ;;  %v812_v22 = vpop.f32.mrb[16].mxu1 }
 0x1d2   :  { %v813_v23 = vpop.f32.mrb[17].mxu1 }
 0x1d3   :  { %v814_v24 = vadd.f32 %v813_v23, %v812_v22  ;;  %v815_v25 = vpop.f32.mrb[18].mxu1  ;;  %v1149_v26 = vpack.c.bf16 %v428_v21, %v427_v19 }
 0x1d4   :  { %v816_v27 = vpop.f32.mrb[19].mxu1 }
 0x1d5   :  { %v411_v28 = vadd.f32 %v814_v24, %v738_v62  ;;  %v817_v29 = vadd.f32 %v816_v27, %v815_v25  ;;  %890 = vmatprep.subr.bf16.mxu0 %v1149_v26 }
 0x1d6   :  { %891 = vmatpush3.bf16.msra.mxu0 %v1149_v26 }
 0x1d7   :  { %v414_v30 = vadd.f32 %v817_v29, %v738_v62  ;;  %v429_v31 = vmax.f32 %v411_v28, 0.0 }
 0x1d9   :  { %v430_v32 = vmax.f32 %v414_v30, 0.0  ;;  %v818_v37 = vpop.f32.mrb[20].mxu1 }
 0x1da   :  { %v819_v38 = vpop.f32.mrb[21].mxu1 }
 0x1db   :  { %v820_v39 = vadd.f32 %v819_v38, %v818_v37  ;;  %v821_v41 = vpop.f32.mrb[22].mxu1  ;;  %v1153_v42 = vpack.c.bf16 %v430_v32, %v429_v31 }
 0x1dc   :  { %v822_v43 = vpop.f32.mrb[23].mxu1 }
 0x1dd   :  { %v419_v44 = vadd.f32 %v820_v39, %v738_v62  ;;  %v823_v46 = vadd.f32 %v822_v43, %v821_v41  ;;  %892 = vmatprep.subr.bf16.mxu0 %v1153_v42 }
 0x1de   :  { %893 = vmatpush3.bf16.msra.mxu0 %v1153_v42 }
 0x1df   :  { %v422_v47 = vadd.f32 %v823_v46, %v738_v62  ;;  %v431_v48 = vmax.f32 %v419_v44, 0.0  ;;  %v943_v62 = vld [vmem:[%s1258_s5 + $0x70] sm:$0xff]  }
 0x1e1   :  { %v432_v49 = vmax.f32 %v422_v47, 0.0 }
 0x1e3   :  { %v1157_v51 = vpack.c.bf16 %v432_v49, %v431_v48 }
 0x1e5   :  { %894 = vmatprep.subr.bf16.mxu0 %v1157_v51 }
 0x1e6   :  { %895 = vmatpush3.bf16.msra.mxu0 %v1157_v51 }
 0x1e7   :  { %832 = vmatprep.subr.bf16.mxu0 %v931_v53 }
 0x1e9   :  { %897 = vmatmul.mubr.msk.bf16.vlgmr.msra.gmra.mrb[0].mxu0 %vm95_vm0, %v1035_v10  ;;  %v937_v10 = vld [vmem:[%s1258_s5 + $0x58] sm:$0xff]  }
 0x1ea   :  { %900 = vmatprep.mubr.msk.bf16.mxu0 %vm95_vm0, %v1043_v12  ;;  %833 = vmatpush3.bf16.msra.mxu0 %v932_v54  ;;  %v938_v12 = vld [vmem:[%s1258_s5 + $0x18] sm:$0xff]  }
 0x1eb   :  { %834 = vmatprep.subr.bf16.mxu0 %v933_v55 }
 0x1ee   :  { %835 = vmatpush3.bf16.msra.mxu0 %v934_v56 }
 0x1ef   :  { %836 = vmatprep.subr.bf16.mxu0 %v935_v57 }
 0x1f1   :  { %901 = vmatmul.mubr.msk.bf16.gmra.mrb[4].mxu0 %vm95_vm0, %v1074_v20  ;;  %v941_v20 = vld [vmem:[%s1258_s5 + $0x68] sm:$0xff]  }
 0x1f2   :  { %837 = vmatpush3.bf16.msra.mxu0 %v936_v58 }
 0x1f3   :  { %838 = vmatprep.subr.bf16.mxu0 %v937_v10 }
 0x1f6   :  { %839 = vmatpush3.bf16.msra.mxu0 %v938_v12 }
 0x1f7   :  { %840 = vmatprep.subr.bf16.mxu0 %v939_v59 }
 0x1fa   :  { %841 = vmatpush3.bf16.msra.mxu0 %v940_v60 }
 0x1fb   :  { %842 = vmatprep.subr.bf16.mxu0 %v941_v20 }
 0x1fe   :  { %843 = vmatpush3.bf16.msra.mxu0 %v942_v61 }
 0x1ff   :  { %844 = vmatprep.subr.bf16.mxu0 %v943_v62 }
 0x202   :  { %845 = vmatpush3.bf16.msra.mxu0 %v944_v63 }
 0x203   :  { %846 = vmatprep.subr.bf16.mxu0 %v945_v0 }
 0x206   :  { %847 = vmatpush3.bf16.msra.mxu0 %v946_v1 }
 0x2bc   :  { %v898_v4 = vpop.f32.mrb[0].mxu0 }
 0x2bd   :  { %v471_v6 = vpop.f32.mrb[1].mxu0  ;;  %v504_v8 = vmul.f32 %v898_v4, %v1116_v34 }
 0x2be   :  { %v899_v7 = vpop.f32.mrb[2].mxu0  ;;  %v502_v11 = vmul.f32 %v471_v6, %v1114_v33 }
 0x2bf   :  { %v505_v9 = vmul.f32 %v899_v7, %v1120_v36  ;;  %v474_v2 = vpop.f32.mrb[3].mxu0 }
 0x2c0   :  { %v503_v13 = vmul.f32 %v474_v2, %v1118_v35 }
 0x2c1   :  { %v511_v3 = vpack.c.bf16 %v505_v9, %v504_v8 }
 0x2c2   :  { %v510_v14 = vpack.c.bf16 %v503_v13, %v502_v11 }
 0x2c4   :  { %v902_v5 = vpop.f32.mrb[4].mxu0  ;;  %681 = vmatprep.mubr.bf16.mxu0 %v510_v14 }
 0x2c5   :  { %v487_v16 = vpop.f32.mrb[5].mxu0  ;;  %682 = vmatmul.mubr.bf16.vlgmr.msra.gmra.mrb[8].mxu0 %v1145_v15  ;;  %v508_v18 = vmul.f32 %v902_v5, %v1130_v50  ;;  %v759_v50 = vld [vmem:[%s1260_s6] ss:$0 sm:$0xff] }
 0x2c6   :  { %v903_v17 = vpop.f32.mrb[6].mxu0  ;;  %689 = vmatprep.mubr.bf16.mxu0 %v511_v3  ;;  %v506_v36 = vmul.f32 %v487_v16, %v1122_v40 }
 0x2c7   :  { %v509_v34 = vmul.f32 %v903_v17, %v1133_v52  ;;  %v490_v19 = vpop.f32.mrb[7].mxu0 }
 0x2c8   :  { %v507_v33 = vmul.f32 %v490_v19, %v1127_v45 }
 0x2c9   :  { %v513_v21 = vpack.c.bf16 %v509_v34, %v508_v18 }
 0x2ca   :  { %v512_v35 = vpack.c.bf16 %v507_v33, %v506_v36 }
 0x2cd   :  { %690 = vmatmul.mubr.bf16.gmra.mrb[12].mxu0 %v1149_v26 }
 0x2ce   :  { %697 = vmatprep.mubr.bf16.mxu0 %v512_v35 }
 0x2d5   :  { %698 = vmatmul.mubr.bf16.gmra.mrb[16].mxu0 %v1153_v42 }
 0x2d6   :  { %705 = vmatprep.mubr.bf16.mxu0 %v513_v21 }
 0x2dd   :  { %706 = vmatmul.mubr.bf16.gmra.mrb[20].mxu0 %v1157_v51 }
 0x398   :  { %v848_v15 = vpop.f32.mrb[8].mxu0 }
 0x399   :  { %v849_v52 = vpop.f32.mrb[9].mxu0 }
 0x39a   :  { %v850_v22 = vadd.f32 %v849_v52, %v848_v15  ;;  %v851_v40 = vpop.f32.mrb[10].mxu0 }
 0x39b   :  { %v852_v23 = vpop.f32.mrb[11].mxu0 }
 0x39c   :  { %v684_v45 = vadd.f32 %v850_v22, %v759_v50  ;;  %v853_v24 = vadd.f32 %v852_v23, %v851_v40 }
 0x39e   :  { %714 = vst [vmem:[%s1261_s7] sm:$0xff] %v684_v45  ;;  %v687_v25 = vadd.f32 %v853_v24, %v759_v50 }
 0x3a0   :  { %715 = vst [vmem:[%s1261_s7 + $0x8] sm:$0xff] %v687_v25  ;;  %v854_v26 = vpop.f32.mrb[12].mxu0 }
 0x3a1   :  { %v855_v27 = vpop.f32.mrb[13].mxu0 }
 0x3a2   :  { %v856_v28 = vadd.f32 %v855_v27, %v854_v26  ;;  %v857_v29 = vpop.f32.mrb[14].mxu0 }
 0x3a3   :  { %v858_v30 = vpop.f32.mrb[15].mxu0 }
 0x3a4   :  { %v692_v31 = vadd.f32 %v856_v28, %v759_v50  ;;  %v859_v32 = vadd.f32 %v858_v30, %v857_v29 }
 0x3a6   :  { %716 = vst [vmem:[%s1261_s7 + $0x10] sm:$0xff] %v692_v31  ;;  %v695_v37 = vadd.f32 %v859_v32, %v759_v50 }
 0x3a8   :  { %717 = vst [vmem:[%s1261_s7 + $0x18] sm:$0xff] %v695_v37  ;;  %v860_v38 = vpop.f32.mrb[16].mxu0 }
 0x3a9   :  { %v861_v39 = vpop.f32.mrb[17].mxu0 }
 0x3aa   :  { %v862_v41 = vadd.f32 %v861_v39, %v860_v38  ;;  %v863_v42 = vpop.f32.mrb[18].mxu0 }
 0x3ab   :  { %v864_v43 = vpop.f32.mrb[19].mxu0 }
 0x3ac   :  { %v700_v44 = vadd.f32 %v862_v41, %v759_v50  ;;  %v865_v46 = vadd.f32 %v864_v43, %v863_v42 }
 0x3ae   :  { %718 = vst [vmem:[%s1261_s7 + $0x20] sm:$0xff] %v700_v44  ;;  %v703_v47 = vadd.f32 %v865_v46, %v759_v50 }
 0x3b0   :  { %719 = vst [vmem:[%s1261_s7 + $0x28] sm:$0xff] %v703_v47  ;;  %v866_v48 = vpop.f32.mrb[20].mxu0 }
 0x3b1   :  { %v867_v49 = vpop.f32.mrb[21].mxu0 }
 0x3b2   :  { %v868_v51 = vadd.f32 %v867_v49, %v866_v48  ;;  %v869_v53 = vpop.f32.mrb[22].mxu0 }
 0x3b3   :  { %v870_v54 = vpop.f32.mrb[23].mxu0 }
 0x3b4   :  { %v708_v55 = vadd.f32 %v868_v51, %v759_v50  ;;  %v871_v56 = vadd.f32 %v870_v54, %v869_v53 }
 0x3b6   :  { %720 = vst [vmem:[%s1261_s7 + $0x30] sm:$0xff] %v708_v55  ;;  %v711_v57 = vadd.f32 %v871_v56, %v759_v50 }
 0x3b8   :  { %721 = vst [vmem:[%s1261_s7 + $0x38] sm:$0xff] %v711_v57 }

</bundles_post_ra>
